<compile_context>
chip_gen: v7x
topology: tpu7x:2x2x1
jax: 0.10.0
libtpu: 0.0.40
codegen_flags: <defaults>
</compile_context>

<pallas_src>
import jax
import jax.numpy as jnp
from jax import lax
from jax.experimental import pallas as pl
from jax.experimental.pallas import tpu as pltpu


def _sum_layer_kernel(x_ref, w_ref, o_ref):
    # x_ref: (Bblk, P*I)  flattened log-probs
    # w_ref: (P*I, P*O)   block-diagonal softmax(weight), resident across grid
    # o_ref: (Bblk, P*O)
    x = x_ref[...].astype(jnp.float32)
    w = w_ref[...]

    # Per-row max shift; guard all -inf rows so the result is -inf, not NaN.
    mx = jnp.max(x, axis=-1, keepdims=True)                        # (Bblk, 1)
    mx = jnp.where(mx > -jnp.inf, mx, 0.0)
    ex = jnp.exp(x - mx)                                           # (Bblk, P*I)

    # One lane-dense MXU matmul; HIGHEST precision keeps full f32 accuracy.
    acc = jnp.dot(ex, w,
                  precision=lax.Precision.HIGHEST,
                  preferred_element_type=jnp.float32)              # (Bblk, P*O)

    o_ref[...] = (mx + jnp.log(acc)).astype(o_ref.dtype)


def sum_layer_forward(x, weight, *, block_b=None, vmem_limit_bytes=None):
    """SumLayer forward: x (B, P, I), weight (P, O, I) -> (B, P, O)."""
    B, P, I = x.shape
    P_w, O, I_w = weight.shape
    assert P == P_w and I == I_w

    PI, PO = P * I, P * O

    # --- Hoisted weight preprocessing (once per call, tiny) -----------------
    # softmax over the input-node axis == exp(log_softmax(weight)), laid out
    # as a block-diagonal (P*I, P*O) matrix so the kernel does one 2D matmul.
    sw = jax.nn.softmax(weight.astype(jnp.float32), axis=2)        # (P, O, I)
    eye = jnp.eye(P, dtype=jnp.float32)
    w_blk = jnp.einsum("poi,pq->piqo", sw, eye).reshape(PI, PO)    # (P*I, P*O)

    # Lane-dense, free contiguous reshape of the input.
    x2 = x.reshape(B, PI)

    # --- Generation-aware VMEM budget ---------------------------------------
    if vmem_limit_bytes is None:
        try:
            vmem_phys = pltpu.get_tpu_info().vmem_capacity_bytes
        except Exception:
            vmem_phys = 64 * 1024 * 1024           # conservative (v7x per-TC)
        if vmem_phys >= 96 * 1024 * 1024:          # v5e / v6e: 128 MiB physical
            vmem_limit_bytes = 64 * 1024 * 1024
        else:                                      # v7x: 64 MiB per TensorCore
            vmem_limit_bytes = 40 * 1024 * 1024

    # Lane-padded footprints (accurate now that blocks are 2D / lane-dense).
    pi_pad = -(-PI // 128) * 128
    po_pad = -(-PO // 128) * 128
    w_bytes = 4 * 2 * (-(-PI // 8) * 8) * po_pad       # (double-buffered) SW

    if block_b is None:
        # Double-buffered x/out slabs + ~3 f32 temps (ex, acc, log result).
        bytes_per_row = 4 * (2 * pi_pad + 2 * po_pad + 3 * (pi_pad + po_pad))
        budget = max(vmem_limit_bytes - w_bytes - (4 << 20), 1 << 20)
        block_b = max(1, budget // bytes_per_row)
        # >= 2 grid steps so both v7x TensorCores get work and the pipeline
        # has something to overlap (single-step grids cannot double-buffer).
        block_b = min(block_b, pl.cdiv(B, 2))
        # (8,128) tiling: second-to-last block dim must be a multiple of 8
        # (or equal to the full batch extent).
        block_b = max(8, (block_b // 8) * 8)
        block_b = min(block_b, B)

    grid_b = pl.cdiv(B, block_b)

    out2 = pl.pallas_call(
        _sum_layer_kernel,
        out_shape=jax.ShapeDtypeStruct((B, PO), x.dtype),
        grid_spec=pltpu.PrefetchScalarGridSpec(
            num_scalar_prefetch=0,
            grid=(grid_b,),
            in_specs=[
                pl.BlockSpec((block_b, PI), lambda b: (b, 0)),   # x slab
                pl.BlockSpec((PI, PO), lambda b: (0, 0)),        # SW (resident)
            ],
            out_specs=pl.BlockSpec((block_b, PO), lambda b: (b, 0)),
        ),
        compiler_params=pltpu.CompilerParams(
            # Batch blocks are independent: shards across the 2 TensorCores on
            # v7x whenever grid_b >= 2; a no-op on single-TC v5e/v6e.
            dimension_semantics=("parallel",),
            vmem_limit_bytes=vmem_limit_bytes,
        ),
    )(x2, w_blk)

    return out2.reshape(B, P, O)


def _reference_forward(x, weight):
    w = jax.nn.log_softmax(weight, axis=2)                   # (P, O, I)
    s = x[:, :, None, :] + w[None, :, :, :]                  # (B, P, O, I)
    return jax.scipy.special.logsumexp(s, axis=3)            # (B, P, O)


if __name__ == "__main__":
    # Small, module-consistent shapes (batch, in_partitions, in_nodes, out_nodes).
    # P*I = P*O = 128 -> exactly one lane width, fully dense stores.
    B, P, I, O = 16, 8, 16, 16

    key = jax.random.PRNGKey(0)
    kx, kw = jax.random.split(key)

    # Synthetic log-probability inputs.
    x = jax.random.normal(kx, (B, P, I), dtype=jnp.float32) - 1.0

    # Deterministic Dirichlet(alpha=1.0) init, stored in log-space (mirrors
    # deeprob's dirichlet_ initializer for the weight parameter).
    alpha = jnp.ones((I,), dtype=jnp.float32)
    weight = jnp.log(jax.random.dirichlet(kw, alpha, shape=(P, O))).astype(jnp.float32)

    # TODO(synk): training-time dropout (random in-place -inf masking) and the
    # mpe/sample paths are not part of the inference forward and are not implemented.

    out = jax.block_until_ready(sum_layer_forward(x, weight))

    ref = _reference_forward(x, weight)
    assert out.shape == (B, P, O)
    assert jnp.allclose(out, ref, atol=1e-5, rtol=1e-5), "mismatch vs reference"

    print("KERNEL_OK")
</pallas_src>

<mosaic_0001>
module attributes {stable_mosaic.version = 11 : i64} {
  func.func @_sum_layer_kernel(%arg0: i32, %arg1: memref<8x128xf32, #tpu.memory_space<vmem>>, %arg2: memref<128x128xf32, #tpu.memory_space<vmem>>, %arg3: memref<8x128xf32, #tpu.memory_space<vmem>>) attributes {dimension_semantics = [#tpu.dimension_semantics<parallel>], iteration_bounds = array<i64: 2>, scalar_prefetch = 0 : i64, scratch_operands = 0 : i64, tpu.core_type = #tpu.core_type<tc>, window_params = [{transform_indices = @transform_0, window_bounds = array<i64: 8, 128>}, {pipeline_mode = #tpu.pipeline_mode<synchronous>, transform_indices = @transform_1, window_bounds = array<i64: 128, 128>}, {transform_indices = @transform_2, window_bounds = array<i64: 8, 128>}]} {
    %c0 = arith.constant 0 : index
    %c0_0 = arith.constant 0 : index
    %0 = vector.load %arg1[%c0, %c0_0] : memref<8x128xf32, #tpu.memory_space<vmem>>, vector<8x128xf32>
    %c0_1 = arith.constant 0 : index
    %c0_2 = arith.constant 0 : index
    %1 = vector.load %arg2[%c0_1, %c0_2] : memref<128x128xf32, #tpu.memory_space<vmem>>, vector<128x128xf32>
    %cst = arith.constant dense<0xFF800000> : vector<8xf32>
    %2 = vector.multi_reduction <maximumf>, %0, %cst [1] : vector<8x128xf32> to vector<8xf32>
    %3 = vector.shape_cast %2 : vector<8xf32> to vector<8x1xf32>
    %cst_3 = arith.constant 0xFF800000 : f32
    %4 = vector.broadcast %cst_3 : f32 to vector<8x1xf32>
    %5 = arith.cmpf ogt, %3, %4 : vector<8x1xf32>
    %cst_4 = arith.constant 0.000000e+00 : f32
    %6 = vector.broadcast %cst_4 : f32 to vector<8x1xf32>
    %7 = arith.select %5, %3, %6 : vector<8x1xi1>, vector<8x1xf32>
    %8 = vector.broadcast %7 : vector<8x1xf32> to vector<8x128xf32>
    %9 = arith.subf %0, %8 : vector<8x128xf32>
    %10 = math.exp %9 : vector<8x128xf32>
    %cst_5 = arith.constant dense<0.000000e+00> : vector<8x128xf32>
    %11 = tpu.matmul %10, %1, %cst_5 {dimension_numbers = #tpu.dot_dimension_numbers<[1], [0], [0], [1], [0, 0, 1, 1], [], []>, precision = #tpu.contract_precision<fp32>} : vector<8x128xf32>, vector<128x128xf32>, vector<8x128xf32> -> vector<8x128xf32>
    %12 = math.log %11 : vector<8x128xf32>
    %13 = vector.broadcast %7 : vector<8x1xf32> to vector<8x128xf32>
    %14 = arith.addf %13, %12 : vector<8x128xf32>
    %c0_6 = arith.constant 0 : index
    %c0_7 = arith.constant 0 : index
    %15 = vector.load %arg3[%c0_6, %c0_7] : memref<8x128xf32, #tpu.memory_space<vmem>>, vector<8x128xf32>
    tpu.vector_store %arg3[%c0_6, %c0_7], %14 {strides = array<i32>} : memref<8x128xf32, #tpu.memory_space<vmem>>, vector<8x128xf32>,
    return
  }
  func.func @transform_0(%arg0: i32) -> (i32, i32) {
    %c0_i32 = arith.constant 0 : i32
    %c0_i32_0 = arith.constant 0 : i32
    return %arg0, %c0_i32 : i32, i32
  }
  func.func @transform_1(%arg0: i32) -> (i32, i32) {
    %c0_i32 = arith.constant 0 : i32
    %c0_i32_0 = arith.constant 0 : i32
    %c0_i32_1 = arith.constant 0 : i32
    return %c0_i32, %c0_i32_0 : i32, i32
  }
  func.func @transform_2(%arg0: i32) -> (i32, i32) {
    %c0_i32 = arith.constant 0 : i32
    %c0_i32_0 = arith.constant 0 : i32
    return %arg0, %c0_i32 : i32, i32
  }
}

</mosaic_0001>

<bundles_post_ra>
// kernel: tpu_custom_call.1
= control target key start
LH: loop header
LB: loop body
LE: loop exit
PB: predicated region body
PF: predicated region fallthrough
CT: control target
= control target key end

     0   :  { %7 = vsyncpa [#allocation3], 0  ;;  %s2088_s0 = inlined_call_operand.hbm [shape: f32[16,128], index: 0, kind: input, shape index: {}]   ;;  %s2089_s1 = inlined_call_operand.hbm [shape: f32[128,128], index: 1, kind: input, shape index: {}]   ;;  %s2090_s2 = inlined_call_operand.hbm [shape: f32[16,128], index: 2, kind: output, shape index: {}]  }
   0x1   :  { %9 = vsyncpa [#allocation3 + $0x1], 0 }
   0x2   :  { %10 = vsyncpa [#allocation6], 0 }
   0x3   :  { %11 = vsyncpa [#allocation4], 0 }
   0x4   :  { %13 = vsyncpa [#allocation4 + $0x1], 0  ;;  %s1635_s9 = smov 0   ;;  %s1637_s10 = smov 0  }
   0x5   :  { %s1639_s11 = smov 0   ;;  %s1641_s12 = smov 0  }
   0x6 LB: > { %s1656_s13 = sadd.s32 4294967295, %s1610_s12   ;;  %s937_s14 = sadd.s32 4294967294, %s1610_s12   ;;  %s1610_s12 = sphi %s1641_s12, %s2110_s12   ;;  %s1606_s11 = sphi %s1639_s11, %s2109_s11   ;;  %s1602_s10 = sphi %s1637_s10, %s2108_s10   ;;  %s1598_s9 = sphi %s1635_s9, %s2107_s9  }
   0x7   : > { %p39_p0 = scmp.ne.s32.totalorder %s1602_s10, %s1598_s9  ;;  %p2091_p1 = scmp.eq.s32.totalorder %s1656_s13, 0 }
   0x8   : > { %p90_p3 = scmp.eq.s32.totalorder %s937_s14, 1  ;;  %p938_p5 = scmp.ge.s32.totalorder %s1610_s12, 1 }
   0x9   : > { %p1665_p4 = por %p2091_p1, %p39_p0  ;;  %p97_p7 = scmp.lt.s32.totalorder %s1610_s12, 3 }
   0xa   : > { %p1670_p6 = por %p90_p3, %p39_p0  ;;  %s1612_s18 = smov [#allocation5]  }
   0xb   : > { %s2094_s15 = scalar_select %p1665_p4, 1, 0 }
   0xc   : > { %s2095_s16 = scalar_select %p1670_p6, 1, 0 }
   0xd   : > { %p1675_p8 = pnand %p938_p5, %p97_p7  ;;  %s109_s19 = sshll.u32 %s1612_s18, 4  ;;  %s1679_s19 = int_to_ptr.vmem [resolvable:$true] %s109_s19 }
   0xe   : > { %s1691_s21 = sadd.s32 1, %s1610_s12   ;;  %s26_s22 = sadd.s32 1, %s1606_s11 }
   0xf   : > { %s2096_s17 = scalar_select %p1675_p8, 1, 0 }
  0x10   : > { %p1424_p9 = pneg %p1675_p8  ;;  %s23_s23 = ssub.s32 %s1610_s12, %s1691_s21 }
  0x11   : > { %s1482_s26 = scalar_lea.hbm %s2089_s1, 2048 }
  0x12   : > { %p1686_p11 = pnand %p1424_p9, %p2091_p1  ;;  %p1483_p12 = scmp.ne.s32.totalorder %s2089_s1, %s1482_s26 }
  0x13   : > { %p1489_p5 = scmp.lt.u32.totalorder %s1482_s26, %s2089_s1 }
  0x14   : > { %p1484_p13 = pneg %p1686_p11 }
  0x16   : > { %p1485_p0 = pnand %p1484_p13, %p1483_p12 }
  0x18   : > { %p1486_p3 = pneg %p1485_p0 }
  0x1a   : > { %p1491_p7 = pnand %p1489_p5, %p1486_p3 }
  0x1c   : > { %1494 = shalt.err (!%p1491_p7)
}
  0x1d   : > { %s1495_s3 = scalar_lea.vmem %s1679_s19, 2048  ;;  %p1503_p2 = scmp.lt.s32.totalorder %s1679_s19, %s1679_s19 }
  0x1e   : > { %p1496_p9 = scmp.ne.s32.totalorder %s1679_s19, %s1495_s3  ;;  %p1504_p6 = scmp.lt.s32.totalorder %s1495_s3, %s1495_s3 }
  0x20   : > { %p1498_p10 = pnand %p1496_p9, %p1484_p13  ;;  %p1505_p4 = por %p1504_p6, %p1503_p2 }
  0x22   : > { %p1499_p1 = pneg %p1498_p10 }
  0x24   : > { %p1506_p8 = pnand %p1505_p4, %p1499_p1 }
  0x26   : > { %1509 = shalt.err (!%p1506_p8)
}
  0x27   : > { %s1613_s4 = smov 128   ;;  %s1614_s5 = smov 8  }
  0x28   : > { %1427 = dma.hbm_to_vmem [thread:$0]  (!%p1686_p11), %s2089_s1, 2048, %s1679_s19, [#allocation6], %s1613_s4, %s1613_s4, %s1614_s5  }
  0x29   : > { %p24_p2 = scmp.eq.s32.totalorder %s23_s23, 0  ;;  %p33_p1 = scmp.ne.s32.totalorder %s1606_s11, %s1602_s10 }
  0x2a   : > { %p34_p4 = scmp.eq.s32.totalorder %s1610_s12, 0  ;;  %p1437_p6 = scmp.lt.s32.totalorder %s1610_s12, 2 }
  0x2b   : > { %s1722_s8 = scalar_select %p24_p2, %s1606_s11, %s26_s22  }
  0x2c   : > { %p35_p8 = por %p34_p4, %p33_p1  ;;  %p2098_p10 = scmp.eq.s32.totalorder %s1656_s13, 1 }
  0x2d   : > { %s123_s18 = sand.u32 1, %s1606_s11   ;;  %s942_s24 = sshll.u32 %s1610_s12, 7 }
  0x2e   : > { %p1726_p12 = por %p2098_p10, %p33_p1  ;;  %s941_s25 = sshll.u32 %s123_s18, 3 }
  0x2f   : > { %s1735_s27 = scalar_lea.hbm %s2088_s0, %s942_s24  ;;  %s127_s19 = scalar_lea.vmem [#allocation2], %s941_s25 }
  0x30   : > { %s134_s22 = sshll.u32 %s127_s19, 4  ;;  %p1737_p11 = pnand %p1437_p6, %p35_p8  ;;  %s1741_s22 = int_to_ptr.vmem [resolvable:$true] %s134_s22 }
  0x31   : > { %s124_s28 = scalar_lea.sflag [#allocation3], %s123_s18  ;;  %s1510_s29 = scalar_lea.hbm %s1735_s27, 128 }
  0x32   : > { %p1511_p13 = scmp.ne.s32.totalorder %s1735_s27, %s1510_s29  ;;  %p1512_p0 = pneg %p1737_p11 }
  0x33   : > { %s1515_s4 = scalar_lea.hbm %s2088_s0, 256  ;;  %p1516_p7 = scmp.lt.u32.totalorder %s1735_s27, %s2088_s0 }
  0x34   : > { %p1513_p3 = pnand %p1512_p0, %p1511_p13  ;;  %p1517_p9 = scmp.lt.u32.totalorder %s1515_s4, %s1510_s29 }
  0x35   : > { %p1519_p1 = scmp.lt.u32.totalorder %s1510_s29, %s1735_s27 }
  0x36   : > { %p1514_p5 = pneg %p1513_p3  ;;  %p1518_p2 = por %p1517_p9, %p1516_p7 }
  0x38   : > { %p1520_p4 = por %p1519_p1, %p1518_p2 }
  0x3a   : > { %p1521_p6 = pnand %p1520_p4, %p1514_p5 }
  0x3c   : > { %1524 = shalt.err (!%p1521_p6)
}
  0x3d   : > { %s1525_s7 = scalar_lea.vmem %s1741_s22, 128  ;;  %s1615_s18 = smov [#allocation2]  }
  0x3e   : > { %p1526_p8 = scmp.ne.s32.totalorder %s1741_s22, %s1525_s7  ;;  %s1530_s24 = sshll.u32 %s1615_s18, 4  ;;  %s1531_s24 = int_to_ptr.vmem [resolvable:$false] %s1530_s24 }
  0x3f   : > { %s1532_s25 = scalar_lea.vmem %s1531_s24, 256  ;;  %p1533_p3 = scmp.lt.s32.totalorder %s1741_s22, %s1531_s24 }
  0x40   : > { %p1528_p10 = pnand %p1526_p8, %p1512_p0  ;;  %p1534_p7 = scmp.lt.s32.totalorder %s1532_s25, %s1525_s7 }
  0x42   : > { %p1529_p13 = pneg %p1528_p10  ;;  %p1535_p9 = por %p1534_p7, %p1533_p3 }
  0x44   : > { %p1536_p2 = pnand %p1535_p9, %p1529_p13 }
  0x46   : > { %1539 = shalt.err (!%p1536_p2)
}
  0x47   : > { %1431 = dma.hbm_to_vmem [thread:$0]  (!%p1737_p11), %s1735_s27, 128, %s1741_s22, %s124_s28  }
  0x48   : > { %p2101_p5 = scmp.ne.s32.totalorder %s2096_s17, 0 }
  0x49   : > { %s1771_s20 = sand.u32 (!%p2101_p5), 1, %s1602_s10   ;;  %p2102_p0 = scmp.ne.s32.totalorder (!%p2101_p5), %s2094_s15, 0 }
  0x4a   : > { %143 = sbr.rel (%p2101_p5) target bundleno = 563 (0x233), region = 28  ;;  %s944_s26 = sshll.u32 (!%p2101_p5), %s1771_s20, 3 }
  0x4b   : > { %s146_s19 = scalar_lea.sflag (!%p2101_p5), [#allocation3], %s1771_s20  ;;  %s149_s29 = scalar_lea.vmem (!%p2101_p5), [#allocation2], %s944_s26 }
  0x51   : > { %1585 = dma.done.wait (%p2102_p0), %s146_s19, 128  }
  0x52   : > { %1587 = vsyncadd (%p2102_p0), %s146_s19, 4294967168  ;;  %p2103_p11 = scmp.eq.s32.totalorder %s1656_s13, 0 }
  0x54   : > { %1589 = dma.done.wait (%p2103_p11), [#allocation6], 2048   ;;  %p2104_p1 = pmov %p2103_p11 }
  0x55   : > { %v1616_v0 = vmov 0.0|0.0   ;;  %v1787_v1 = vld [vmem:[%s149_s29] sm:$0xff]  ;;  %v175_v2 = vld [vmem:[#allocation5] sm:$0xff]  ;;  %v176_v3 = vld [vmem:[#allocation5 + $0x8] sm:$0xff]  ;;  %vm1617_vm0 = vmmov 0   ;;  %v1618_v59 = vmov 0.0  }
  0x56   : > { %1591 = vsyncadd (%p2104_p1), [#allocation6], 4294965248  ;;  %1335 = vmatprep.subr.bf16.mxu0 %v1616_v0  ;;  %1263 = vmatprep.subr.bf16.mxu1 %v1616_v0  ;;  %v199_v4 = vand.u32 4294901760, %v175_v2  ;;  %v202_v5 = vand.u32 4294901760, %v176_v3  ;;  %v177_v6 = vld [vmem:[#allocation5 + $0x10] sm:$0xff]  ;;  %v178_v7 = vld [vmem:[#allocation5 + $0x18] sm:$0xff] }
  0x57   : > { %191 = vmax.xlane.f32.xlu0 %v1787_v1  ;;  %v205_v8 = vand.u32 4294901760, %v177_v6  ;;  %v208_v9 = vand.u32 4294901760, %v178_v7  ;;  %v179_v16 = vld [vmem:[#allocation5 + $0x20] sm:$0xff]  ;;  %v180_v17 = vld [vmem:[#allocation5 + $0x28] sm:$0xff]  ;;  %v181_v21 = vld [vmem:[#allocation5 + $0x30] sm:$0xff]  ;;  %1190 = vmatprep.mubr.msk.f32.mxu0 %vm1617_vm0, %v1618_v59  ;;  %s948_s15 = sshll.u32 %s1656_s13, 7 }
  0x58   : > { %v1790_v10 = vpack.c.bf16 %v202_v5, %v199_v4  ;;  %v1792_v11 = vsub.f32 %v175_v2, %v199_v4  ;;  %v1794_v12 = vsub.f32 %v176_v3, %v202_v5  ;;  %v211_v18 = vand.u32 4294901760, %v179_v16  ;;  %v182_v22 = vld [vmem:[#allocation5 + $0x38] sm:$0xff]  ;;  %v183_v26 = vld [vmem:[#allocation5 + $0x40] sm:$0xff]  ;;  %v184_v27 = vld [vmem:[#allocation5 + $0x48] sm:$0xff]  ;;  %1085 = vmatprep.mubr.msk.f32.mxu1 %vm1617_vm0, %v1618_v59  ;;  %s173_s17 = scalar_lea.vmem [#allocation7], %s944_s26  ;;  %s2044_s28 = scalar_lea.hbm %s2090_s2, %s948_s15 }
  0x59   : > { %v1796_v13 = vsub.f32 %v177_v6, %v205_v8  ;;  %v1798_v14 = vsub.f32 %v178_v7, %v208_v9  ;;  %v1802_v15 = vpack.c.bf16 %v208_v9, %v205_v8  ;;  %v214_v19 = vand.u32 4294901760, %v180_v17  ;;  %v185_v31 = vld [vmem:[#allocation5 + $0x50] sm:$0xff]  ;;  %v186_v32 = vld [vmem:[#allocation5 + $0x58] sm:$0xff]  ;;  %v187_v36 = vld [vmem:[#allocation5 + $0x60] sm:$0xff]  ;;  %s857_s27 = sshll.u32 %s173_s17, 4  ;;  %s844_s30 = scalar_lea.sflag [#allocation4], %s1771_s20  ;;  %s2046_s27 = int_to_ptr.vmem [resolvable:$true] %s857_s27 }
  0x5a   : > { %1337 = vmatpush3.bf16.msra.mxu0 %v1790_v10  ;;  %1265 = vmatpush3.bf16.msra.mxu1 %v1790_v10  ;;  %v217_v23 = vand.u32 4294901760, %v181_v21  ;;  %v220_v24 = vand.u32 4294901760, %v182_v22  ;;  %v223_v28 = vand.u32 4294901760, %v183_v26  ;;  %v226_v29 = vand.u32 4294901760, %v184_v27  ;;  %v188_v37 = vld [vmem:[#allocation5 + $0x68] sm:$0xff]  ;;  %v189_v41 = vld [vmem:[#allocation5 + $0x70] sm:$0xff] }
  0x5b   : > { %1338 = vmatprep.subr.bf16.mxu0 %v1616_v0  ;;  %1266 = vmatprep.subr.bf16.mxu1 %v1616_v0  ;;  %v1810_v20 = vpack.c.bf16 %v214_v19, %v211_v18  ;;  %v229_v33 = vand.u32 4294901760, %v185_v31  ;;  %v232_v34 = vand.u32 4294901760, %v186_v32  ;;  %v235_v38 = vand.u32 4294901760, %v187_v36  ;;  %v190_v42 = vld [vmem:[#allocation5 + $0x78] sm:$0xff]  ;;  %s1540_s3 = scalar_lea.vmem %s2046_s27, 128  ;;  %s1619_s13 = smov [#allocation7]  }
  0x5c   : > { %v1816_v25 = vpack.c.bf16 %v220_v24, %v217_v23  ;;  %v1822_v30 = vpack.c.bf16 %v226_v29, %v223_v28  ;;  %v238_v39 = vand.u32 4294901760, %v188_v37  ;;  %v241_v43 = vand.u32 4294901760, %v189_v41  ;;  %p1541_p4 = scmp.ne.s32.totalorder %s2046_s27, %s1540_s3  ;;  %s1544_s4 = sshll.u32 %s1619_s13, 4  ;;  %s1545_s4 = int_to_ptr.vmem [resolvable:$false] %s1544_s4 }
  0x5d   : > { %v1828_v35 = vpack.c.bf16 %v232_v34, %v229_v33  ;;  %v244_v44 = vand.u32 4294901760, %v190_v42  ;;  %v1840_v45 = vsub.f32 %v179_v16, %v211_v18  ;;  %v1842_v46 = vsub.f32 %v180_v17, %v214_v19  ;;  %s1546_s5 = scalar_lea.vmem %s1545_s4, 256  ;;  %p1547_p10 = scmp.lt.s32.totalorder %s2046_s27, %s1545_s4 }
  0x5e   : > { %1340 = vmatpush3.bf16.msra.mxu0 %v1802_v15  ;;  %1268 = vmatpush3.bf16.msra.mxu1 %v1802_v15  ;;  %v1834_v40 = vpack.c.bf16 %v238_v39, %v235_v38  ;;  %v1844_v47 = vsub.f32 %v181_v21, %v217_v23  ;;  %v1846_v48 = vsub.f32 %v182_v22, %v220_v24  ;;  %v292_v58 = vand.u32 4294901760, %v1792_v11  ;;  %p1542_p6 = pnand %p1541_p4, %p1726_p12  ;;  %p1548_p13 = scmp.lt.s32.totalorder %s1546_s5, %s1540_s3 }
  0x5f   : > { %1341 = vmatprep.subr.bf16.mxu0 %v1616_v0  ;;  %1269 = vmatprep.subr.bf16.mxu1 %v1616_v0  ;;  %v1848_v49 = vsub.f32 %v183_v26, %v223_v28  ;;  %v1850_v50 = vsub.f32 %v184_v27, %v226_v29  ;;  %v1852_v51 = vsub.f32 %v185_v31, %v229_v33  ;;  %v299_v60 = vand.u32 4294901760, %v1794_v12 }
  0x60   : > { %v1854_v52 = vsub.f32 %v186_v32, %v232_v34  ;;  %v1856_v53 = vsub.f32 %v187_v36, %v235_v38  ;;  %v1858_v54 = vsub.f32 %v188_v37, %v238_v39  ;;  %v1860_v55 = vpack.c.bf16 %v244_v44, %v241_v43  ;;  %p1543_p8 = pneg %p1542_p6  ;;  %p1549_p3 = por %p1548_p13, %p1547_p10 }
  0x61   : > { %v1862_v56 = vsub.f32 %v189_v41, %v241_v43  ;;  %v1864_v57 = vsub.f32 %v190_v42, %v244_v44  ;;  %v293_v61 = vsub.f32 %v1792_v11, %v292_v58  ;;  %v1874_v62 = vpack.c.bf16 %v299_v60, %v292_v58 }
  0x62   : > { %1343 = vmatpush3.bf16.msra.mxu0 %v1810_v20  ;;  %1271 = vmatpush3.bf16.msra.mxu1 %v1810_v20  ;;  %v300_v63 = vsub.f32 %v1794_v12, %v299_v60  ;;  %v306_v3 = vand.u32 4294901760, %v1796_v13  ;;  %v313_v4 = vand.u32 4294901760, %v1798_v14  ;;  %v320_v18 = vand.u32 4294901760, %v1840_v45  ;;  %p1550_p7 = pnand %p1549_p3, %p1543_p8 }
  0x63   : > { %1344 = vmatprep.subr.bf16.mxu0 %v1616_v0  ;;  %1272 = vmatprep.subr.bf16.mxu1 %v1616_v0  ;;  %v294_v2 = vand.u32 4294901760, %v293_v61  ;;  %v327_v19 = vand.u32 4294901760, %v1842_v46  ;;  %v334_v28 = vand.u32 4294901760, %v1844_v47  ;;  %v341_v29 = vand.u32 4294901760, %v1846_v48 }
  0x64   : > { %v301_v5 = vand.u32 4294901760, %v300_v63  ;;  %v1882_v6 = vpack.c.bf16 %v313_v4, %v306_v3  ;;  %v307_v7 = vsub.f32 %v1796_v13, %v306_v3  ;;  %v314_v8 = vsub.f32 %v1798_v14, %v313_v4 }
  0x65   : > { %v1892_v22 = vpack.c.bf16 %v327_v19, %v320_v18  ;;  %v321_v23 = vsub.f32 %v1840_v45, %v320_v18  ;;  %v328_v24 = vsub.f32 %v1842_v46, %v327_v19  ;;  %v1900_v32 = vpack.c.bf16 %v341_v29, %v334_v28 }
  0x66   : > { %1346 = vmatpush3.bf16.msra.mxu0 %v1816_v25  ;;  %1274 = vmatpush3.bf16.msra.mxu1 %v1816_v25  ;;  %v1886_v9 = vpack.c.bf16 %v301_v5, %v294_v2  ;;  %v308_v16 = vand.u32 4294901760, %v307_v7  ;;  %v315_v17 = vand.u32 4294901760, %v314_v8  ;;  %v335_v33 = vsub.f32 %v1844_v47, %v334_v28 }
  0x67   : > { %1347 = vmatprep.subr.bf16.mxu0 %v1616_v0  ;;  %1275 = vmatprep.subr.bf16.mxu1 %v1616_v0  ;;  %v322_v26 = vand.u32 4294901760, %v321_v23  ;;  %v329_v27 = vand.u32 4294901760, %v328_v24  ;;  %v342_v34 = vsub.f32 %v1846_v48, %v341_v29  ;;  %v348_v38 = vand.u32 4294901760, %v1848_v49 }
  0x68   : > { %v1890_v21 = vpack.c.bf16 %v315_v17, %v308_v16  ;;  %v336_v36 = vand.u32 4294901760, %v335_v33  ;;  %v355_v39 = vand.u32 4294901760, %v1850_v50  ;;  %v362_v61 = vand.u32 4294901760, %v1852_v51 }
  0x69   : > { %v1898_v31 = vpack.c.bf16 %v329_v27, %v322_v26  ;;  %v343_v37 = vand.u32 4294901760, %v342_v34  ;;  %v349_v43 = vsub.f32 %v1848_v49, %v348_v38  ;;  %v369_v63 = vand.u32 4294901760, %v1854_v52 }
  0x6a   : > { %1349 = vmatpush3.bf16.msra.mxu0 %v1822_v30  ;;  %1277 = vmatpush3.bf16.msra.mxu1 %v1822_v30  ;;  %v1908_v42 = vpack.c.bf16 %v355_v39, %v348_v38  ;;  %v356_v44 = vsub.f32 %v1850_v50, %v355_v39  ;;  %v363_v4 = vsub.f32 %v1852_v51, %v362_v61  ;;  %v376_v16 = vand.u32 4294901760, %v1856_v53 }
  0x6b   : > { %1350 = vmatprep.subr.bf16.mxu0 %v1616_v0  ;;  %1278 = vmatprep.subr.bf16.mxu1 %v1616_v0  ;;  %v1906_v41 = vpack.c.bf16 %v343_v37, %v336_v36  ;;  %v350_v58 = vand.u32 4294901760, %v349_v43  ;;  %v1916_v3 = vpack.c.bf16 %v369_v63, %v362_v61  ;;  %v370_v5 = vsub.f32 %v1854_v52, %v369_v63 }
  0x6c   : > { %v357_v60 = vand.u32 4294901760, %v356_v44  ;;  %v364_v7 = vand.u32 4294901760, %v363_v4  ;;  %v383_v17 = vand.u32 4294901760, %v1858_v54  ;;  %v377_v23 = vsub.f32 %v1856_v53, %v376_v16 }
  0x6d   : > { %v371_v8 = vand.u32 4294901760, %v370_v5  ;;  %v390_v28 = vand.u32 4294901760, %v1862_v56  ;;  %v397_v29 = vand.u32 4294901760, %v1864_v57  ;;  %v1312_v44 = vpack.c.bf16 %v1794_v12, %v1792_v11 }
  0x6e   : > { %1352 = vmatpush3.bf16.msra.mxu0 %v1828_v35  ;;  %1280 = vmatpush3.bf16.msra.mxu1 %v1828_v35  ;;  %v1914_v2 = vpack.c.bf16 %v357_v60, %v350_v58  ;;  %v1378_v19 = vpack.c.bf16 %v383_v17, %v376_v16  ;;  %v384_v24 = vsub.f32 %v1858_v54, %v383_v17  ;;  %v378_v26 = vand.u32 4294901760, %v377_v23 }
  0x6f   : > { %1353 = vmatprep.subr.bf16.mxu0 %v1616_v0  ;;  %1281 = vmatprep.subr.bf16.mxu1 %v1616_v0  ;;  %v1303_v18 = vpack.c.bf16 %v371_v8, %v364_v7  ;;  %v1381_v34 = vpack.c.bf16 %v397_v29, %v390_v28  ;;  %v391_v36 = vsub.f32 %v1862_v56, %v390_v28 }
  0x70   : > { %v385_v27 = vand.u32 4294901760, %v384_v24  ;;  %v398_v37 = vsub.f32 %v1864_v57, %v397_v29  ;;  %v1315_v58 = vpack.c.bf16 %v1798_v14, %v1796_v13  ;;  %v1318_v60 = vpack.c.bf16 %v1842_v46, %v1840_v45 }
  0x71   : > { %v392_v38 = vand.u32 4294901760, %v391_v36  ;;  %v1321_v61 = vpack.c.bf16 %v1846_v48, %v1844_v47  ;;  %v1324_v63 = vpack.c.bf16 %v1850_v50, %v1848_v49  ;;  %v1327_v4 = vpack.c.bf16 %v1854_v52, %v1852_v51 }
  0x72   : > { %1355 = vmatpush3.bf16.msra.mxu0 %v1834_v40  ;;  %1283 = vmatpush3.bf16.msra.mxu1 %v1834_v40  ;;  %v1306_v33 = vpack.c.bf16 %v385_v27, %v378_v26  ;;  %v399_v39 = vand.u32 4294901760, %v398_v37  ;;  %v1330_v5 = vpack.c.bf16 %v1858_v54, %v1856_v53  ;;  %v1333_v11 = vpack.c.bf16 %v1864_v57, %v1862_v56 }
  0x73   : > { %1356 = vmatprep.subr.bf16.mxu0 %v1616_v0  ;;  %1284 = vmatprep.subr.bf16.mxu1 %v1616_v0 }
  0x74   : > { %v1309_v43 = vpack.c.bf16 %v399_v39, %v392_v38 }
  0x76   : > { %1358 = vmatpush3.bf16.msra.mxu0 %v1860_v55  ;;  %1286 = vmatpush3.bf16.msra.mxu1 %v1860_v55 }
  0x77   : > { %1359 = vmatprep.subr.bf16.mxu0 %v1616_v0  ;;  %1287 = vmatprep.subr.bf16.mxu1 %v1616_v0 }
  0xe4   : > { %v192_v12 = vpop.xlane.xlu0 %191 }
  0xe5   : > { %vm193_vm1 = vcmp.gt.f32.partialorder %v192_v12, -inf }
  0xe6   : > { %v1944_v7 = vsel %vm193_vm1, %v192_v12, 0.0 }
  0xe7   : > { %v195_v8 = vsub.f32 %v1787_v1, %v1944_v7 }
  0xe9   : > { %v196_v16 = vmul.f32 1.442695, %v195_v8 }
  0xeb   : > { %1478 = vpow2.f32 %v196_v16 }
  0xf5   : > { %v1479_v17 = vpop.eup %1478 }
  0xf6   : > { %v1948_v23 = vand.u32 4294901760, %v1479_v17 }
  0xf8   : > { %v1951_v24 = vsub.f32 %v1479_v17, %v1948_v23 }
  0xfa   : > { %v281_v26 = vand.u32 4294901760, %v1951_v24 }
  0xfc   : > { %1191 = vmatmul.mubr.f32.vlgmr.msra.gmra.mrb[0].mxu0 %v281_v26  ;;  %v282_v27 = vsub.f32 %v1951_v24, %v281_v26 }
  0xfd   : > { %1361 = vmatpush3.bf16.msra.mxu0 %v1874_v62  ;;  %1225 = vmatprep.mubr.msk.f32.mxu0 %vm1617_vm0, %v1618_v59 }
  0xfe   : > { %1362 = vmatprep.subr.bf16.mxu0 %v1616_v0  ;;  %v283_v1 = vand.u32 4294901760, %v282_v27 }
 0x100   : > { %1086 = vmatmul.mubr.f32.vlgmr.msra.gmra.mrb[0].mxu1 %v283_v1 }
 0x101   : > { %1289 = vmatpush3.bf16.msra.mxu1 %v1886_v9  ;;  %1364 = vmatpush3.bf16.msra.mxu0 %v1882_v6 }
 0x102   : > { %1290 = vmatprep.subr.bf16.mxu1 %v1616_v0  ;;  %1365 = vmatprep.subr.bf16.mxu0 %v1616_v0 }
 0x103   : > { %1120 = vmatprep.mubr.msk.f32.mxu1 %vm1617_vm0, %v1618_v59 }
 0x105   : > { %1292 = vmatpush3.bf16.msra.mxu1 %v1890_v21  ;;  %1367 = vmatpush3.bf16.msra.mxu0 %v1892_v22 }
 0x106   : > { %1293 = vmatprep.subr.bf16.mxu1 %v1616_v0  ;;  %1368 = vmatprep.subr.bf16.mxu0 %v1616_v0 }
 0x109   : > { %1295 = vmatpush3.bf16.msra.mxu1 %v1898_v31  ;;  %1370 = vmatpush3.bf16.msra.mxu0 %v1900_v32 }
 0x10a   : > { %1296 = vmatprep.subr.bf16.mxu1 %v1616_v0  ;;  %1371 = vmatprep.subr.bf16.mxu0 %v1616_v0 }
 0x10d   : > { %1298 = vmatpush3.bf16.msra.mxu1 %v1906_v41  ;;  %1373 = vmatpush3.bf16.msra.mxu0 %v1908_v42 }
 0x10e   : > { %1299 = vmatprep.subr.bf16.mxu1 %v1616_v0  ;;  %1374 = vmatprep.subr.bf16.mxu0 %v1616_v0 }
 0x111   : > { %1301 = vmatpush3.bf16.msra.mxu1 %v1914_v2  ;;  %1376 = vmatpush3.bf16.msra.mxu0 %v1916_v3 }
 0x112   : > { %1302 = vmatprep.subr.bf16.mxu1 %v1616_v0  ;;  %1377 = vmatprep.subr.bf16.mxu0 %v1616_v0 }
 0x115   : > { %1304 = vmatpush3.bf16.msra.mxu1 %v1303_v18  ;;  %1379 = vmatpush3.bf16.msra.mxu0 %v1378_v19 }
 0x116   : > { %1305 = vmatprep.subr.bf16.mxu1 %v1616_v0  ;;  %1380 = vmatprep.subr.bf16.mxu0 %v1616_v0 }
 0x119   : > { %1307 = vmatpush3.bf16.msra.mxu1 %v1306_v33  ;;  %1382 = vmatpush3.bf16.msra.mxu0 %v1381_v34 }
 0x11a   : > { %1308 = vmatprep.subr.bf16.mxu1 %v1616_v0  ;;  %1383 = vmatprep.subr.bf16.mxu0 %v1616_v0 }
 0x11c   : > { %1226 = vmatmul.mubr.f32.vlgmr.msra.gmra.mrb[0].mxu0 %v1948_v23 }
 0x11d   : > { %1310 = vmatpush3.bf16.msra.mxu1 %v1309_v43  ;;  %1385 = vmatpush3.bf16.msra.mxu0 %v1790_v10 }
 0x11e   : > { %1311 = vmatprep.subr.bf16.mxu1 %v1616_v0  ;;  %1386 = vmatprep.subr.bf16.mxu0 %v1616_v0 }
 0x11f   : > { %1260 = vmatprep.mubr.msk.f32.mxu0 %vm1617_vm0, %v1618_v59 }
 0x120   : > { %1121 = vmatmul.mubr.f32.vlgmr.msra.gmra.mrb[0].mxu1 %v1948_v23 }
 0x121   : > { %1313 = vmatpush3.bf16.msra.mxu1 %v1312_v44  ;;  %1388 = vmatpush3.bf16.msra.mxu0 %v1802_v15 }
 0x122   : > { %1314 = vmatprep.subr.bf16.mxu1 %v1616_v0  ;;  %1389 = vmatprep.subr.bf16.mxu0 %v1616_v0 }
 0x123   : > { %1155 = vmatprep.mubr.msk.f32.mxu1 %vm1617_vm0, %v1618_v59 }
 0x125   : > { %1316 = vmatpush3.bf16.msra.mxu1 %v1315_v58  ;;  %1391 = vmatpush3.bf16.msra.mxu0 %v1810_v20 }
 0x126   : > { %1317 = vmatprep.subr.bf16.mxu1 %v1616_v0  ;;  %1392 = vmatprep.subr.bf16.mxu0 %v1616_v0 }
 0x129   : > { %1319 = vmatpush3.bf16.msra.mxu1 %v1318_v60  ;;  %1394 = vmatpush3.bf16.msra.mxu0 %v1816_v25 }
 0x12a   : > { %1320 = vmatprep.subr.bf16.mxu1 %v1616_v0  ;;  %1395 = vmatprep.subr.bf16.mxu0 %v1616_v0 }
 0x12d   : > { %1322 = vmatpush3.bf16.msra.mxu1 %v1321_v61  ;;  %1397 = vmatpush3.bf16.msra.mxu0 %v1822_v30 }
 0x12e   : > { %1323 = vmatprep.subr.bf16.mxu1 %v1616_v0  ;;  %1398 = vmatprep.subr.bf16.mxu0 %v1616_v0 }
 0x131   : > { %1325 = vmatpush3.bf16.msra.mxu1 %v1324_v63  ;;  %1400 = vmatpush3.bf16.msra.mxu0 %v1828_v35 }
 0x132   : > { %1326 = vmatprep.subr.bf16.mxu1 %v1616_v0  ;;  %1401 = vmatprep.subr.bf16.mxu0 %v1616_v0 }
 0x135   : > { %1328 = vmatpush3.bf16.msra.mxu1 %v1327_v4  ;;  %1403 = vmatpush3.bf16.msra.mxu0 %v1834_v40 }
 0x136   : > { %1329 = vmatprep.subr.bf16.mxu1 %v1616_v0  ;;  %1404 = vmatprep.subr.bf16.mxu0 %v1616_v0 }
 0x139   : > { %1331 = vmatpush3.bf16.msra.mxu1 %v1330_v5  ;;  %1406 = vmatpush3.bf16.msra.mxu0 %v1860_v55 }
 0x13a   : > { %1332 = vmatprep.subr.bf16.mxu1 %v1616_v0 }
 0x13c   : > { %1261 = vmatmul.mubr.f32.vlgmr.msra.gmra.mrb[0].mxu0 %v1948_v23 }
 0x13d   : > { %1334 = vmatpush3.bf16.msra.mxu1 %v1333_v11 }
 0x140   : > { %1156 = vmatmul.mubr.f32.vlgmr.msra.gmra.mrb[0].mxu1 %v1951_v24 }
 0x20f   : > { %v835_v10 = vpop.f32.mrb[0].mxu0 }
 0x210   : > { %v1262_v13 = vpop.f32.mrb[1].mxu0 }
 0x213   : > { %v540_v14 = vpop.f32.mrb[0].mxu1 }
 0x214   : > { %v1407_v15 = vadd.f32 %v835_v10, %v540_v14  ;;  %v1157_v20 = vpop.f32.mrb[1].mxu1 }
 0x216   : > { %1480 = vlog2.f32 %v1407_v15 }
 0x220   : > { %v1481_v25 = vpop.eup %1480 }
 0x221   : > { %v840_v0 = vmul.f32 0.6931472, %v1481_v25 }
 0x223   : > { %v841_v30 = vadd.f32 %v840_v0, %v1944_v7 }
 0x225   : > { %842 = vst [vmem:[%s173_s17] sm:$0xff] %v841_v30 }
 0x226   : > { %1553 = shalt.err (!%p1550_p7)
}
 0x227   : > { %s1554_s6 = scalar_lea.hbm %s2044_s28, 128  ;;  %s1558_s24 = scalar_lea.hbm %s2090_s2, 256 }
 0x228   : > { %p1555_p9 = scmp.ne.s32.totalorder %s2044_s28, %s1554_s6  ;;  %p1559_p0 = scmp.lt.u32.totalorder %s2044_s28, %s2090_s2 }
 0x229   : > { %p1560_p11 = scmp.lt.u32.totalorder %s1558_s24, %s1554_s6  ;;  %p1562_p4 = scmp.lt.u32.totalorder %s1554_s6, %s2044_s28 }
 0x22a   : > { %p1556_p2 = pnand %p1555_p9, %p1726_p12 }
 0x22b   : > { %p1561_p1 = por %p1560_p11, %p1559_p0 }
 0x22c   : > { %p1557_p5 = pneg %p1556_p2 }
 0x22d   : > { %p1563_p6 = por %p1562_p4, %p1561_p1 }
 0x22f   : > { %p1564_p8 = pnand %p1563_p6, %p1557_p5 }
 0x231   : > { %1567 = shalt.err (!%p1564_p8)
}
 0x232   : > { %1422 = dma.vmem_to_hbm [thread:$0]  (%p1726_p12), %s2046_s27, 128, %s2044_s28, %s844_s30  }
 0x233 PF: > { %s869_s26 = sand.u32 1, %s1598_s9   ;;  %p2105_p10 = scmp.ne.s32.totalorder %s2095_s16, 0 }
 0x234   : > { %p2106_p13 = scmp.ge.s32.totalorder %s1610_s12, 2  ;;  %s870_s19 = scalar_lea.sflag [#allocation4], %s869_s26 }
 0x236   : > { %p1433_p3 = pnand %p2106_p13, %p2105_p10 }
 0x238   : > { %1593 = dma.done.wait (!%p1433_p3), %s870_s19, 128  }
 0x239   : > { %1595 = vsyncadd (!%p1433_p3), %s870_s19, 4294967168  ;;  %p16_p7 = scmp.ge.s32.totalorder %s1691_s21, 4   ;;  %s2107_s9 = smov %s1602_s10 }
 0x23a   : > { %s2108_s10 = smov %s1606_s11  ;;  %s2109_s11 = smov %s1722_s8 }
 0x23b   : > { %s2110_s12 = smov %s1691_s21  ;;  %18 = sbr.rel (!%p16_p7) target bundleno = 6 (0x6), region = 77 }
 0x242   :  { %875 = vsyncpa [#allocation3], 1 }
 0x243   :  { %877 = vsyncpa [#allocation3 + $0x1], 1 }
 0x244   :  { %878 = vsyncpa [#allocation6], 1 }
 0x245   :  { %879 = vsyncpa [#allocation4], 1 }
 0x246   :  { %881 = vsyncpa [#allocation4 + $0x1], 1 }

</bundles_post_ra>
